<compile_context>
chip_gen: v7x
topology: tpu7x:2x2x1
jax: 0.10.0
libtpu: 0.0.40
codegen_flags: <defaults>
</compile_context>

<pallas_src>
import functools

import jax
import jax.numpy as jnp
from jax.experimental import pallas as pl
from jax.experimental.pallas import tpu as pltpu


def readout_kernel(x_ref, w_ref, b_ref, o_ref, acc_ref):
    # x_ref: (tm, tk)   w_ref: (tk, tn)   b_ref: (1, tn)
    # o_ref: (tm, tn)   acc_ref: (tm, tn) f32 scratch (resident across k)
    @pl.when(pl.program_id(2) == 0)
    def _():
        acc_ref[...] = jnp.zeros_like(acc_ref)

    # MXU matmul, f32 accumulation, no transpose inside the kernel.
    acc_ref[...] += jnp.dot(
        x_ref[...], w_ref[...], preferred_element_type=jnp.float32
    )

    @pl.when(pl.program_id(2) == pl.num_programs(2) - 1)
    def _():
        o_ref[...] = (acc_ref[...] + b_ref[...]).astype(o_ref.dtype)


def _round_up(x: int, m: int) -> int:
    return ((x + m - 1) // m) * m


def readout_forward(x, weight, bias, *, tm=None, tn=None, tk=None,
                    compute_dtype=None):
    """F.linear(x, weight, bias) as a tiled Pallas TPU kernel.

    x:      (B, F)
    weight: (T, F)   (torch.nn.Linear layout)
    bias:   (T,)
    returns (B, T) in x.dtype

    compute_dtype: optionally cast x / weight (e.g. jnp.bfloat16 on v6e) while
                   keeping f32 accumulation and an f32 bias add.
    """
    B, F = x.shape
    T, F2 = weight.shape
    assert F == F2, "feature dim mismatch"
    out_dtype = x.dtype

    # MXU / lane-aligned tile defaults, capped at the (padded) problem size.
    if tm is None:
        tm = min(128, _round_up(B, 8))        # sublane multiple of 8 (f32)
    if tn is None:
        tn = min(256, _round_up(T, 128))      # lane-dense output tiles
    if tk is None:
        tk = min(512, _round_up(F, 128))      # contraction tile, mult. of 128

    Bp = _round_up(B, tm)
    Tp = _round_up(T, tn)
    Fp = _round_up(F, tk)

    # Pre-transpose the weight once in the wrapper: (T, F) -> (F, T).
    wt = weight.T

    if compute_dtype is not None:
        x = x.astype(compute_dtype)
        wt = wt.astype(compute_dtype)

    # Zero-pad to tile-aligned shapes (zeros contribute nothing to the matmul).
    if (Bp, Fp) != (B, F):
        x = jnp.pad(x, ((0, Bp - B), (0, Fp - F)))
    if (Fp, Tp) != (F, T):
        wt = jnp.pad(wt, ((0, Fp - F), (0, Tp - T)))
    bias2d = bias.reshape(1, T).astype(jnp.float32)
    if Tp != T:
        bias2d = jnp.pad(bias2d, ((0, 0), (0, Tp - T)))

    grid = (Bp // tm, Tp // tn, Fp // tk)

    out = pl.pallas_call(
        readout_kernel,
        out_shape=jax.ShapeDtypeStruct((Bp, Tp), out_dtype),
        grid_spec=pltpu.PrefetchScalarGridSpec(
            num_scalar_prefetch=0,
            grid=grid,
            in_specs=[
                pl.BlockSpec((tm, tk), lambda i, j, k: (i, k)),   # x tile
                pl.BlockSpec((tk, tn), lambda i, j, k: (k, j)),   # W.T tile
                pl.BlockSpec((1, tn), lambda i, j, k: (0, j)),    # bias tile
            ],
            out_specs=pl.BlockSpec((tm, tn), lambda i, j, k: (i, j)),
            scratch_shapes=[pltpu.VMEM((tm, tn), jnp.float32)],
        ),
        compiler_params=pltpu.CompilerParams(
            dimension_semantics=("parallel", "parallel", "arbitrary"),
            # Explicit budget: safe on v5e (16 MiB scoped default would be the
            # only binding constraint) and well under v7x's 64 MiB physical.
            vmem_limit_bytes=48 * 1024 * 1024,
        ),
    )(x, wt, bias2d)

    # Slice padding back off.
    return out[:B, :T]


if __name__ == "__main__":
    # Deterministic synthetic parameters (the torch module leaves them
    # uninitialized until .fit(); we draw them from PRNGKey(0)).
    batch = 40
    num_features = 300
    num_targets = 75

    key = jax.random.PRNGKey(0)
    kx, kw, kb = jax.random.split(key, 3)
    x = jax.random.normal(kx, (batch, num_features), dtype=jnp.float32)
    weight = jax.random.normal(kw, (num_targets, num_features), dtype=jnp.float32) * 0.1
    bias = jax.random.normal(kb, (num_targets,), dtype=jnp.float32) * 0.1

    y_ref = x @ weight.T + bias

    # 1) Default (aligned) tiles: exercises padding of B/F/T + lane-dense out.
    y = jax.block_until_ready(readout_forward(x, weight, bias))
    assert y.shape == (batch, num_targets)
    assert jnp.allclose(y, y_ref, atol=1e-4, rtol=1e-4), "mismatch (default tiles)"

    # 2) Explicit small tiles: exercises the multi-step (i, j, k) grid and the
    #    VMEM accumulator / init / finalize path.
    y2 = jax.block_until_ready(
        readout_forward(x, weight, bias, tm=16, tn=128, tk=128)
    )
    assert jnp.allclose(y2, y_ref, atol=1e-4, rtol=1e-4), "mismatch (tiled grid)"

    # TODO(synk): fit()/fit_readout (ridge solve via pinverse) is a host-side
    # training utility, not part of the forward hot path; left out of Pallas.
    print("KERNEL_OK")
</pallas_src>

<mosaic_0001>
module attributes {stable_mosaic.version = 11 : i64} {
  func.func @readout_kernel(%arg0: i32, %arg1: i32, %arg2: i32, %arg3: memref<40x384xf32, #tpu.memory_space<vmem>>, %arg4: memref<384x128xf32, #tpu.memory_space<vmem>>, %arg5: memref<1x128xf32, #tpu.memory_space<vmem>>, %arg6: memref<40x128xf32, #tpu.memory_space<vmem>>, %arg7: memref<40x128xf32, #tpu.memory_space<vmem>>) attributes {dimension_semantics = [#tpu.dimension_semantics<parallel>, #tpu.dimension_semantics<parallel>, #tpu.dimension_semantics<arbitrary>], iteration_bounds = array<i64: 1, 1, 1>, scalar_prefetch = 0 : i64, scratch_operands = 1 : i64, tpu.core_type = #tpu.core_type<tc>, window_params = [{transform_indices = @transform_0, window_bounds = array<i64: 40, 384>}, {transform_indices = @transform_1, window_bounds = array<i64: 384, 128>}, {transform_indices = @transform_2, window_bounds = array<i64: 1, 128>}, {transform_indices = @transform_3, window_bounds = array<i64: 40, 128>}]} {
    %c0_i32 = arith.constant 0 : i32
    %0 = arith.cmpi eq, %arg2, %c0_i32 : i32
    %1 = arith.extui %0 : i1 to i32
    %c0_i32_0 = arith.constant 0 : i32
    %2 = arith.cmpi ne, %1, %c0_i32_0 : i32
    scf.if %2 {
      %cst_10 = arith.constant 0.000000e+00 : f32
      %12 = vector.broadcast %cst_10 : f32 to vector<40x128xf32>
      %c0_11 = arith.constant 0 : index
      %c0_12 = arith.constant 0 : index
      %13 = vector.load %arg7[%c0_11, %c0_12] : memref<40x128xf32, #tpu.memory_space<vmem>>, vector<40x128xf32>
      tpu.vector_store %arg7[%c0_11, %c0_12], %12 {strides = array<i32>} : memref<40x128xf32, #tpu.memory_space<vmem>>, vector<40x128xf32>,
    } else {
    }
    %c0 = arith.constant 0 : index
    %c0_1 = arith.constant 0 : index
    %3 = vector.load %arg7[%c0, %c0_1] : memref<40x128xf32, #tpu.memory_space<vmem>>, vector<40x128xf32>
    %c0_2 = arith.constant 0 : index
    %c0_3 = arith.constant 0 : index
    %4 = vector.load %arg3[%c0_2, %c0_3] : memref<40x384xf32, #tpu.memory_space<vmem>>, vector<40x384xf32>
    %c0_4 = arith.constant 0 : index
    %c0_5 = arith.constant 0 : index
    %5 = vector.load %arg4[%c0_4, %c0_5] : memref<384x128xf32, #tpu.memory_space<vmem>>, vector<384x128xf32>
    %cst = arith.constant dense<0.000000e+00> : vector<40x128xf32>
    %6 = tpu.matmul %4, %5, %cst {dimension_numbers = #tpu.dot_dimension_numbers<[1], [0], [0], [1], [0, 0, 1, 1], [], []>} : vector<40x384xf32>, vector<384x128xf32>, vector<40x128xf32> -> vector<40x128xf32>
    %7 = arith.addf %3, %6 : vector<40x128xf32>
    %c0_6 = arith.constant 0 : index
    %c0_7 = arith.constant 0 : index
    %8 = vector.load %arg7[%c0_6, %c0_7] : memref<40x128xf32, #tpu.memory_space<vmem>>, vector<40x128xf32>
    tpu.vector_store %arg7[%c0_6, %c0_7], %7 {strides = array<i32>} : memref<40x128xf32, #tpu.memory_space<vmem>>, vector<40x128xf32>,
    %c0_i32_8 = arith.constant 0 : i32
    %9 = arith.cmpi eq, %arg2, %c0_i32_8 : i32
    %10 = arith.extui %9 : i1 to i32
    %c0_i32_9 = arith.constant 0 : i32
    %11 = arith.cmpi ne, %10, %c0_i32_9 : i32
    scf.if %11 {
      %c0_10 = arith.constant 0 : index
      %c0_11 = arith.constant 0 : index
      %12 = vector.load %arg7[%c0_10, %c0_11] : memref<40x128xf32, #tpu.memory_space<vmem>>, vector<40x128xf32>
      %c0_12 = arith.constant 0 : index
      %c0_13 = arith.constant 0 : index
      %13 = vector.load %arg5[%c0_12, %c0_13] : memref<1x128xf32, #tpu.memory_space<vmem>>, vector<1x128xf32>
      %14 = vector.broadcast %13 : vector<1x128xf32> to vector<40x128xf32>
      %15 = arith.addf %12, %14 : vector<40x128xf32>
      %c0_14 = arith.constant 0 : index
      %c0_15 = arith.constant 0 : index
      %16 = vector.load %arg6[%c0_14, %c0_15] : memref<40x128xf32, #tpu.memory_space<vmem>>, vector<40x128xf32>
      tpu.vector_store %arg6[%c0_14, %c0_15], %15 {strides = array<i32>} : memref<40x128xf32, #tpu.memory_space<vmem>>, vector<40x128xf32>,
    } else {
    }
    return
  }
  func.func @transform_0(%arg0: i32, %arg1: i32, %arg2: i32) -> (i32, i32) {
    %c0_i32 = arith.constant 0 : i32
    return %arg0, %arg2 : i32, i32
  }
  func.func @transform_1(%arg0: i32, %arg1: i32, %arg2: i32) -> (i32, i32) {
    %c0_i32 = arith.constant 0 : i32
    return %arg2, %arg1 : i32, i32
  }
  func.func @transform_2(%arg0: i32, %arg1: i32, %arg2: i32) -> (i32, i32) {
    %c0_i32 = arith.constant 0 : i32
    %c0_i32_0 = arith.constant 0 : i32
    return %c0_i32, %arg1 : i32, i32
  }
  func.func @transform_3(%arg0: i32, %arg1: i32, %arg2: i32) -> (i32, i32) {
    %c0_i32 = arith.constant 0 : i32
    return %arg0, %arg1 : i32, i32
  }
}

</mosaic_0001>

<bundles_post_ra>
// kernel: tpu_custom_call.1
= control target key start
LH: loop header
LB: loop body
LE: loop exit
PB: predicated region body
PF: predicated region fallthrough
CT: control target
= control target key end

     0   :  { %8 = vsyncpa [#allocation4], 0  ;;  %s700_s0 = inlined_call_operand.hbm [shape: f32[40,384], index: 0, kind: input, shape index: {}]   ;;  %s701_s1 = inlined_call_operand.hbm [shape: f32[384,128], index: 1, kind: input, shape index: {}]   ;;  %s702_s2 = inlined_call_operand.vmem [shape: f32[1,128], index: 2, kind: input, shape index: {}]   ;;  %s703_s3 = inlined_call_operand.hbm [shape: f32[40,128], index: 3, kind: output, shape index: {}]  }
   0x1   :  { %9 = vsyncpa [#allocation7], 0 }
   0x2   :  { %10 = vsyncpa [#allocation5], 0  ;;  %s607_s12 = smov [#allocation3]   ;;  %s535_s16 = scalar_lea.hbm %s700_s0, 1920 }
   0x3   :  { %s16_s13 = sshll.u32 %s607_s12, 4  ;;  %p536_p0 = scmp.ne.s32.totalorder %s700_s0, %s535_s16  ;;  %s17_s13 = int_to_ptr.vmem [resolvable:$true] %s16_s13 }
   0x4   :  { %p539_p1 = scmp.lt.u32.totalorder %s535_s16, %s700_s0 }
   0x6   :  { %p541_p2 = pnand %p539_p1, %p536_p0 }
   0x8   :  { %544 = shalt.err (!%p541_p2)
}
   0x9   :  { %s545_s21 = scalar_lea.vmem %s17_s13, 1920  ;;  %p550_p4 = scmp.lt.s32.totalorder %s17_s13, %s17_s13 }
   0xa   :  { %p546_p3 = scmp.ne.s32.totalorder %s17_s13, %s545_s21  ;;  %p551_p5 = scmp.lt.s32.totalorder %s545_s21, %s545_s21 }
   0xc   :  { %p552_p6 = por %p551_p5, %p550_p4 }
   0xe   :  { %p553_p7 = pnand %p552_p6, %p546_p3 }
  0x10   :  { %556 = shalt.err (!%p553_p7)
}
  0x11   :  { %s608_s22 = smov 384   ;;  %s609_s23 = smov 24  }
  0x12   :  { %22 = dma.hbm_to_vmem [thread:$0]  %s700_s0, 1920, %s17_s13, [#allocation4], %s608_s22, %s608_s22, %s609_s23  }
  0x13   :  { %s610_s26 = smov [#allocation6]   ;;  %s557_s30 = scalar_lea.hbm %s701_s1, 6144 }
  0x14   :  { %s28_s27 = sshll.u32 %s610_s26, 4  ;;  %p558_p8 = scmp.ne.s32.totalorder %s701_s1, %s557_s30  ;;  %s29_s27 = int_to_ptr.vmem [resolvable:$true] %s28_s27 }
  0x15   :  { %p561_p9 = scmp.lt.u32.totalorder %s557_s30, %s701_s1 }
  0x17   :  { %p563_p10 = pnand %p561_p9, %p558_p8 }
  0x19   :  { %566 = shalt.err (!%p563_p10)
}
  0x1a   :  { %s567_s8 = scalar_lea.vmem %s29_s27, 6144  ;;  %p572_p12 = scmp.lt.s32.totalorder %s29_s27, %s29_s27 }
  0x1b   :  { %p568_p11 = scmp.ne.s32.totalorder %s29_s27, %s567_s8  ;;  %p573_p13 = scmp.lt.s32.totalorder %s567_s8, %s567_s8 }
  0x1d   :  { %p574_p0 = por %p573_p13, %p572_p12 }
  0x1f   :  { %p575_p1 = pnand %p574_p0, %p568_p11 }
  0x21   :  { %578 = shalt.err (!%p575_p1)
}
  0x22   :  { %s611_s0 = smov 128   ;;  %s612_s9 = smov 8  }
  0x23   :  { %34 = dma.hbm_to_vmem [thread:$0]  %s701_s1, 6144, %s29_s27, [#allocation7], %s611_s0, %s611_s0, %s612_s9  }
  0x24   :  { %601 = dma.done.wait [#allocation4], 1920  }
  0x25   :  { %602 = vsyncadd [#allocation4], 4294965376 }
  0x26   :  { %603 = dma.done.wait [#allocation7], 6144  }
  0x27   :  { %604 = vsyncadd [#allocation7], 4294961152  ;;  %v613_v0 = vmov 0.0|0.0   ;;  %vm614_vm0 = vmmov 0   ;;  %v615_v1 = vmov 0.0   ;;  %v88_v2 = vld [vmem:[#allocation6 + $0x80] sm:$0xff] }
  0x28   :  { %501 = vmatprep.subr.bf16.mxu1 %v613_v0  ;;  %454 = vmatprep.mubr.msk.f32.mxu1 %vm614_vm0, %v615_v1  ;;  %v89_v3 = vld [vmem:[#allocation6 + $0x88] sm:$0xff]  ;;  %v72_v4 = vld [vmem:[#allocation6] sm:$0xff]  ;;  %v90_v11 = vld [vmem:[#allocation6 + $0x90] sm:$0xff] }
  0x29   :  { %v469_v5 = vpack.c.bf16 %v89_v3, %v88_v2  ;;  %v73_v6 = vld [vmem:[#allocation6 + $0x8] sm:$0xff]  ;;  %v104_v7 = vld [vmem:[#allocation6 + $0x100] sm:$0xff]  ;;  %v91_v12 = vld [vmem:[#allocation6 + $0x98] sm:$0xff] }
  0x2a   :  { %v105_v8 = vld [vmem:[#allocation6 + $0x108] sm:$0xff]  ;;  %v471_v9 = vpack.c.bf16 %v73_v6, %v72_v4  ;;  %v74_v13 = vld [vmem:[#allocation6 + $0x10] sm:$0xff]  ;;  %v473_v14 = vpack.c.bf16 %v91_v12, %v90_v11  ;;  %v75_v15 = vld [vmem:[#allocation6 + $0x18] sm:$0xff] }
  0x2b   :  { %v502_v10 = vpack.c.bf16 %v105_v8, %v104_v7  ;;  %470 = vmatprep.subr.bf16.mxu0 %v469_v5  ;;  %v106_v16 = vld [vmem:[#allocation6 + $0x110] sm:$0xff]  ;;  %v107_v17 = vld [vmem:[#allocation6 + $0x118] sm:$0xff]  ;;  %v475_v18 = vpack.c.bf16 %v75_v15, %v74_v13  ;;  %v92_v20 = vld [vmem:[#allocation6 + $0xa0] sm:$0xff] }
  0x2c   :  { %472 = vmatpush3.bf16.msra.mxu0 %v471_v9  ;;  %v505_v19 = vpack.c.bf16 %v107_v17, %v106_v16  ;;  %v93_v21 = vld [vmem:[#allocation6 + $0xa8] sm:$0xff]  ;;  %v76_v22 = vld [vmem:[#allocation6 + $0x20] sm:$0xff]  ;;  %v94_v27 = vld [vmem:[#allocation6 + $0xb0] sm:$0xff] }
  0x2d   :  { %503 = vmatpush3.bf16.msra.mxu1 %v502_v10  ;;  %474 = vmatprep.subr.bf16.mxu0 %v473_v14  ;;  %v477_v23 = vpack.c.bf16 %v93_v21, %v92_v20  ;;  %v77_v24 = vld [vmem:[#allocation6 + $0x28] sm:$0xff]  ;;  %v108_v25 = vld [vmem:[#allocation6 + $0x120] sm:$0xff]  ;;  %v95_v28 = vld [vmem:[#allocation6 + $0xb8] sm:$0xff] }
  0x2e   :  { %504 = vmatprep.subr.bf16.mxu1 %v613_v0  ;;  %v109_v26 = vld [vmem:[#allocation6 + $0x128] sm:$0xff]  ;;  %v479_v29 = vpack.c.bf16 %v77_v24, %v76_v22  ;;  %v78_v31 = vld [vmem:[#allocation6 + $0x30] sm:$0xff]  ;;  %v481_v32 = vpack.c.bf16 %v95_v28, %v94_v27  ;;  %v79_v33 = vld [vmem:[#allocation6 + $0x38] sm:$0xff] }
  0x2f   :  { %v508_v30 = vpack.c.bf16 %v109_v26, %v108_v25  ;;  %v110_v34 = vld [vmem:[#allocation6 + $0x130] sm:$0xff]  ;;  %v111_v35 = vld [vmem:[#allocation6 + $0x138] sm:$0xff]  ;;  %v96_v36 = vld [vmem:[#allocation6 + $0xc0] sm:$0xff]  ;;  %v483_v38 = vpack.c.bf16 %v79_v33, %v78_v31 }
  0x30   :  { %476 = vmatpush3.bf16.msra.mxu0 %v475_v18  ;;  %v97_v37 = vld [vmem:[#allocation6 + $0xc8] sm:$0xff]  ;;  %v511_v39 = vpack.c.bf16 %v111_v35, %v110_v34  ;;  %v80_v40 = vld [vmem:[#allocation6 + $0x40] sm:$0xff]  ;;  %v98_v45 = vld [vmem:[#allocation6 + $0xd0] sm:$0xff] }
  0x31   :  { %506 = vmatpush3.bf16.msra.mxu1 %v505_v19  ;;  %478 = vmatprep.subr.bf16.mxu0 %v477_v23  ;;  %v485_v41 = vpack.c.bf16 %v97_v37, %v96_v36  ;;  %v81_v42 = vld [vmem:[#allocation6 + $0x48] sm:$0xff]  ;;  %v112_v43 = vld [vmem:[#allocation6 + $0x140] sm:$0xff]  ;;  %v99_v46 = vld [vmem:[#allocation6 + $0xd8] sm:$0xff] }
  0x32   :  { %507 = vmatprep.subr.bf16.mxu1 %v613_v0  ;;  %v113_v44 = vld [vmem:[#allocation6 + $0x148] sm:$0xff]  ;;  %v58_v47 = vld [vmem:[#allocation3 + $0x8] sm:$0xff]  ;;  %v487_v48 = vpack.c.bf16 %v81_v42, %v80_v40  ;;  %v489_v51 = vpack.c.bf16 %v99_v46, %v98_v45  ;;  %v83_v52 = vld [vmem:[#allocation6 + $0x58] sm:$0xff] }
  0x33   :  { %v514_v49 = vpack.c.bf16 %v113_v44, %v112_v43  ;;  %v82_v50 = vld [vmem:[#allocation6 + $0x50] sm:$0xff]  ;;  %v115_v54 = vld [vmem:[#allocation6 + $0x158] sm:$0xff]  ;;  %v100_v55 = vld [vmem:[#allocation6 + $0xe0] sm:$0xff]  ;;  %184 = vmatprep.mubr.f32.mxu0 %v58_v47 }
  0x34   :  { %480 = vmatpush3.bf16.msra.mxu0 %v479_v29  ;;  %v114_v53 = vld [vmem:[#allocation6 + $0x150] sm:$0xff]  ;;  %v101_v56 = vld [vmem:[#allocation6 + $0xe8] sm:$0xff]  ;;  %v491_v57 = vpack.c.bf16 %v83_v52, %v82_v50  ;;  %v84_v59 = vld [vmem:[#allocation6 + $0x60] sm:$0xff] }
  0x35   :  { %509 = vmatpush3.bf16.msra.mxu1 %v508_v30  ;;  %482 = vmatprep.subr.bf16.mxu0 %v481_v32  ;;  %v517_v58 = vpack.c.bf16 %v115_v54, %v114_v53  ;;  %v493_v60 = vpack.c.bf16 %v101_v56, %v100_v55  ;;  %v85_v61 = vld [vmem:[#allocation6 + $0x68] sm:$0xff]  ;;  %v116_v62 = vld [vmem:[#allocation6 + $0x160] sm:$0xff]  ;;  %v102_v2 = vld [vmem:[#allocation6 + $0xf0] sm:$0xff] }
  0x36   :  { %510 = vmatprep.subr.bf16.mxu1 %v613_v0  ;;  %v117_v63 = vld [vmem:[#allocation6 + $0x168] sm:$0xff]  ;;  %v103_v3 = vld [vmem:[#allocation6 + $0xf8] sm:$0xff]  ;;  %v495_v4 = vpack.c.bf16 %v85_v61, %v84_v59  ;;  %v86_v6 = vld [vmem:[#allocation6 + $0x70] sm:$0xff] }
  0x37   :  { %v520_v5 = vpack.c.bf16 %v117_v63, %v116_v62  ;;  %v497_v7 = vpack.c.bf16 %v103_v3, %v102_v2  ;;  %v87_v8 = vld [vmem:[#allocation6 + $0x78] sm:$0xff]  ;;  %v118_v9 = vld [vmem:[#allocation6 + $0x170] sm:$0xff]  ;;  %v57_v13 = vld [vmem:[#allocation3] sm:$0xff] }
  0x38   :  { %484 = vmatpush3.bf16.msra.mxu0 %v483_v38  ;;  %v119_v10 = vld [vmem:[#allocation6 + $0x178] sm:$0xff]  ;;  %v499_v11 = vpack.c.bf16 %v87_v8, %v86_v6  ;;  %v61_v15 = vld [vmem:[#allocation3 + $0x20] sm:$0xff]  ;;  %v60_v16 = vld [vmem:[#allocation3 + $0x18] sm:$0xff] }
  0x39   :  { %512 = vmatpush3.bf16.msra.mxu1 %v511_v39  ;;  %486 = vmatprep.subr.bf16.mxu0 %v485_v41  ;;  %v523_v12 = vpack.c.bf16 %v119_v10, %v118_v9  ;;  %v59_v14 = vld [vmem:[#allocation3 + $0x10] sm:$0xff]  ;;  %v62_v17 = vld [vmem:[#allocation3 + $0x28] sm:$0xff]  ;;  %v64_v18 = vld [vmem:[#allocation3 + $0x38] sm:$0xff] }
  0x3a   :  { %513 = vmatprep.subr.bf16.mxu1 %v613_v0  ;;  %v63_v19 = vld [vmem:[#allocation3 + $0x30] sm:$0xff]  ;;  %v66_v21 = vld [vmem:[#allocation3 + $0x48] sm:$0xff]  ;;  %v68_v22 = vld [vmem:[#allocation3 + $0x58] sm:$0xff] }
  0x3b   :  { %v67_v20 = vld [vmem:[#allocation3 + $0x50] sm:$0xff]  ;;  %v70_v23 = vld [vmem:[#allocation3 + $0x68] sm:$0xff]  ;;  %v69_v24 = vld [vmem:[#allocation3 + $0x60] sm:$0xff] }
  0x3c   :  { %488 = vmatpush3.bf16.msra.mxu0 %v487_v48  ;;  %v71_v25 = vld [vmem:[#allocation3 + $0x70] sm:$0xff]  ;;  %v353_v31 = vld [vmem:[%s702_s2] ss:$0 sm:$0xff]  ;;  %s616_s2 = smov [#allocation8]  }
  0x3d   :  { %515 = vmatpush3.bf16.msra.mxu1 %v514_v49  ;;  %490 = vmatprep.subr.bf16.mxu0 %v489_v51  ;;  %s340_s13 = sshll.u32 %s616_s2, 4  ;;  %s341_s13 = int_to_ptr.vmem [resolvable:$true] %s340_s13 }
  0x3e   :  { %516 = vmatprep.subr.bf16.mxu1 %v613_v0  ;;  %s579_s14 = scalar_lea.vmem %s341_s13, 640  ;;  %p584_p3 = scmp.lt.s32.totalorder %s341_s13, %s341_s13 }
  0x3f   :  { %p580_p2 = scmp.ne.s32.totalorder %s341_s13, %s579_s14  ;;  %p585_p4 = scmp.lt.s32.totalorder %s579_s14, %s579_s14 }
  0x40   :  { %492 = vmatpush3.bf16.msra.mxu0 %v491_v57 }
  0x41   :  { %518 = vmatpush3.bf16.msra.mxu1 %v517_v58  ;;  %494 = vmatprep.subr.bf16.mxu0 %v493_v60  ;;  %p586_p5 = por %p585_p4, %p584_p3 }
  0x42   :  { %519 = vmatprep.subr.bf16.mxu1 %v613_v0 }
  0x43   :  { %p587_p6 = pnand %p586_p5, %p580_p2 }
  0x44   :  { %496 = vmatpush3.bf16.msra.mxu0 %v495_v4 }
  0x45   :  { %521 = vmatpush3.bf16.msra.mxu1 %v520_v5  ;;  %498 = vmatprep.subr.bf16.mxu0 %v497_v7 }
  0x46   :  { %522 = vmatprep.subr.bf16.mxu1 %v613_v0  ;;  %v65_v0 = vld [vmem:[#allocation3 + $0x40] sm:$0xff] }
  0x48   :  { %500 = vmatpush3.bf16.msra.mxu0 %v499_v11 }
  0x49   :  { %524 = vmatpush3.bf16.msra.mxu1 %v523_v12 }
  0x4b   :  { %185 = vmatmul.mubr.f32.vlgmr.msra.gmra.mrb[0].mxu0 %v57_v13 }
  0x4c   :  { %455 = vmatmul.mubr.f32.vlgmr.msra.gmra.mrb[0].mxu1 %v59_v14  ;;  %189 = vmatprep.mubr.f32.mxu0 %v61_v15 }
  0x4d   :  { %457 = vmatprep.mubr.msk.f32.mxu1 %vm614_vm0, %v615_v1 }
  0x4f   :  { %190 = vmatmul.mubr.f32.gmra.mrb[2].mxu0 %v60_v16 }
  0x50   :  { %458 = vmatmul.mubr.f32.gmra.mrb[2].mxu1 %v62_v17  ;;  %194 = vmatprep.mubr.f32.mxu0 %v64_v18 }
  0x51   :  { %460 = vmatprep.mubr.msk.f32.mxu1 %vm614_vm0, %v615_v1 }
  0x53   :  { %195 = vmatmul.mubr.f32.gmra.mrb[4].mxu0 %v63_v19 }
  0x54   :  { %461 = vmatmul.mubr.f32.gmra.mrb[4].mxu1 %v65_v0  ;;  %199 = vmatprep.mubr.f32.mxu0 %v67_v20 }
  0x55   :  { %463 = vmatprep.mubr.msk.f32.mxu1 %vm614_vm0, %v615_v1 }
  0x57   :  { %200 = vmatmul.mubr.f32.gmra.mrb[6].mxu0 %v66_v21 }
  0x58   :  { %464 = vmatmul.mubr.f32.gmra.mrb[6].mxu1 %v68_v22  ;;  %204 = vmatprep.mubr.f32.mxu0 %v70_v23 }
  0x59   :  { %466 = vmatprep.mubr.msk.f32.mxu1 %vm614_vm0, %v615_v1 }
  0x5b   :  { %205 = vmatmul.mubr.f32.gmra.mrb[8].mxu0 %v69_v24 }
  0x5c   :  { %467 = vmatmul.mubr.f32.gmra.mrb[8].mxu1 %v71_v25 }
 0x11e   :  { %v386_v26 = vpop.f32.mrb[0].mxu0 }
 0x11f   :  { %v276_v27 = vpop.f32.mrb[0].mxu1  ;;  %v387_v28 = vpop.f32.mrb[1].mxu0 }
 0x120   :  { %v456_v29 = vpop.f32.mrb[1].mxu1  ;;  %v388_v30 = vadd.f32 %v387_v28, %v386_v26 }
 0x122   :  { %v277_v32 = vadd.f32 %v388_v30, %v276_v27  ;;  %v389_v33 = vpop.f32.mrb[2].mxu0 }
 0x123   :  { %v281_v34 = vpop.f32.mrb[2].mxu1  ;;  %v390_v35 = vpop.f32.mrb[3].mxu0 }
 0x124   :  { %v459_v36 = vpop.f32.mrb[3].mxu1  ;;  %v325_v37 = vadd.f32 %v353_v31, %v277_v32  ;;  %v391_v38 = vadd.f32 %v390_v35, %v389_v33 }
 0x126   :  { %330 = vst [vmem:[#allocation8] sm:$0xff] %v325_v37  ;;  %v282_v1 = vadd.f32 %v391_v38, %v281_v34  ;;  %v392_v39 = vpop.f32.mrb[4].mxu0 }
 0x127   :  { %v286_v40 = vpop.f32.mrb[4].mxu1  ;;  %v393_v41 = vpop.f32.mrb[5].mxu0 }
 0x128   :  { %v462_v42 = vpop.f32.mrb[5].mxu1  ;;  %v326_v43 = vadd.f32 %v353_v31, %v282_v1  ;;  %v394_v44 = vadd.f32 %v393_v41, %v392_v39 }
 0x12a   :  { %331 = vst [vmem:[#allocation8 + $0x8] sm:$0xff] %v326_v43  ;;  %v287_v45 = vadd.f32 %v394_v44, %v286_v40  ;;  %v395_v46 = vpop.f32.mrb[6].mxu0 }
 0x12b   :  { %v291_v47 = vpop.f32.mrb[6].mxu1  ;;  %v396_v48 = vpop.f32.mrb[7].mxu0 }
 0x12c   :  { %v465_v49 = vpop.f32.mrb[7].mxu1  ;;  %v327_v50 = vadd.f32 %v353_v31, %v287_v45  ;;  %v397_v51 = vadd.f32 %v396_v48, %v395_v46 }
 0x12e   :  { %332 = vst [vmem:[#allocation8 + $0x10] sm:$0xff] %v327_v50  ;;  %v292_v52 = vadd.f32 %v397_v51, %v291_v47  ;;  %v398_v53 = vpop.f32.mrb[8].mxu0 }
 0x12f   :  { %v296_v54 = vpop.f32.mrb[8].mxu1  ;;  %v399_v55 = vpop.f32.mrb[9].mxu0 }
 0x130   :  { %v468_v56 = vpop.f32.mrb[9].mxu1  ;;  %v328_v57 = vadd.f32 %v353_v31, %v292_v52  ;;  %v400_v58 = vadd.f32 %v399_v55, %v398_v53 }
 0x132   :  { %333 = vst [vmem:[#allocation8 + $0x18] sm:$0xff] %v328_v57  ;;  %v297_v59 = vadd.f32 %v400_v58, %v296_v54 }
 0x134   :  { %v329_v60 = vadd.f32 %v353_v31, %v297_v59 }
 0x136   :  { %334 = vst [vmem:[#allocation8 + $0x20] sm:$0xff] %v329_v60 }
 0x137   :  { %590 = shalt.err (!%p587_p6)
}
 0x138   :  { %s591_s17 = scalar_lea.hbm %s703_s3, 640 }
 0x139   :  { %p592_p7 = scmp.ne.s32.totalorder %s703_s3, %s591_s17  ;;  %p595_p8 = scmp.lt.u32.totalorder %s591_s17, %s703_s3 }
 0x13b   :  { %p597_p9 = pnand %p595_p8, %p592_p7 }
 0x13d   :  { %600 = shalt.err (!%p597_p9)
}
 0x13e   :  { %346 = dma.vmem_to_hbm [thread:$0]  %s341_s13, 640, %s703_s3, [#allocation5], %s611_s0, %s611_s0, %s612_s9  }
 0x13f   :  { %605 = dma.done.wait [#allocation5], 640  }
 0x140   :  { %606 = vsyncadd [#allocation5], 4294966656 }
 0x141   :  { %350 = vsyncpa [#allocation4], 1 }
 0x142   :  { %351 = vsyncpa [#allocation7], 1 }
 0x143   :  { %352 = vsyncpa [#allocation5], 1 }

</bundles_post_ra>
